<compile_context>
chip_gen: v7x
topology: tpu7x:2x2x1
jax: 0.10.0
libtpu: 0.0.40
codegen_flags: <defaults>
</compile_context>

<pallas_src>
import functools
import math

import jax
import jax.numpy as jnp
from jax.experimental import pallas as pl
from jax.experimental.pallas import tpu as pltpu


def _round_up(x, m):
    return (x + m - 1) // m * m


def _largest_divisor_tile(total, limit, quantum=128):
    """Largest multiple of `quantum` that divides `total` (itself a multiple of
    `quantum`) and does not exceed max(limit, quantum)."""
    m = total // quantum
    limit_q = max(limit // quantum, 1)
    best = 1
    for d in range(1, m + 1):
        if m % d == 0 and d <= limit_q:
            best = d
    return best * quantum


def _box2fc_kernel(x_ref, w1_ref, w2_ref, wh_ref, aux_ref, out_ref, acc_ref):
    # x_ref: (P, TN, TK) bf16 roi features for this (row, K) tile.
    P, TN, TK = x_ref.shape
    Fp = w1_ref.shape[1]
    Hp = wh_ref.shape[1]
    k = pl.program_id(1)
    nk = pl.num_programs(1)

    @pl.when(k == 0)
    def _():
        acc_ref[...] = jnp.zeros(acc_ref.shape, acc_ref.dtype)

    # fc1 partial product for this K tile: ONE (P*TN, TK) x (TK, F) MXU pass
    # covering all P inputs (BN1 scale is pre-folded into w1's columns).
    x = x_ref[...].reshape(P * TN, TK)
    acc_ref[...] += jnp.dot(x, w1_ref[...], preferred_element_type=jnp.float32)

    @pl.when(k == nk - 1)
    def _():
        b1 = aux_ref[0:1, :Fp]
        b2 = aux_ref[1:2, :Fp]
        bh = aux_ref[2:3, :Hp]

        # Folded BN1 bias + ReLU, then elementwise max over the P inputs
        # (sublane-sliced VPU max; P is static & tiny so the loop unrolls).
        hf = jnp.maximum(acc_ref[...] + b1, 0.0)
        h = hf[:TN]
        for p in range(1, P):
            h = jnp.maximum(h, hf[p * TN:(p + 1) * TN])

        # fc2 (BN2 scale folded into w2) + folded bias + ReLU.
        h2 = jnp.dot(h.astype(w2_ref.dtype), w2_ref[...],
                     preferred_element_type=jnp.float32)
        h2 = jnp.maximum(h2 + b2, 0.0)

        # Fused loc/cls heads: single lane-dense (TN, H_pad) output block.
        out = jnp.dot(h2.astype(wh_ref.dtype), wh_ref[...],
                      preferred_element_type=jnp.float32) + bh
        out_ref[...] = out.astype(out_ref.dtype)


@functools.partial(jax.jit, static_argnames=("num_classes", "tile_n", "tile_k"))
def _box2fc_forward(ps, w1, w2, wh, aux, *, num_classes, tile_n=256, tile_k=2048):
    """ps: tuple of (N, C, H, W) (or (N, K)) f32 roi features."""
    P = len(ps)
    N = ps[0].shape[0]
    K = math.prod(ps[0].shape[1:])
    K_pad, F_pad = w1.shape
    H_pad = wh.shape[1]

    # Row tile: multiple of 16 (bf16 sublane packing); for small N pick
    # ceil(N/2) rounded up so the "parallel" axis has >=2 steps (v7x dual TC).
    tn = min(_round_up(tile_n, 16), max(16, _round_up((N + 1) // 2, 16)))
    N_pad = _round_up(N, tn)

    # K tile: largest 128-multiple dividing K_pad that fits tile_k, so large
    # in_channels stream through VMEM instead of keeping w1 fully resident.
    tk = _largest_divisor_tile(K_pad, _round_up(tile_k, 128))

    # Pad + cast the roi features (bf16 halves activation HBM traffic).  Built
    # under this jit and flagged in allow_input_fusion so XLA may fuse the
    # stack/pad/cast producer directly into the kernel's input DMA.
    x = jnp.zeros((P, N_pad, K_pad), jnp.bfloat16)
    for idx, p in enumerate(ps):
        x = x.at[idx, :N, :K].set(p.reshape(N, K).astype(jnp.bfloat16))

    grid = (N_pad // tn, K_pad // tk)

    # Explicit VMEM budget (default scoped limit is only 16/32 MiB).
    est = (2 * P * tn * tk * 2          # x (double buffered, bf16)
           + 2 * tk * F_pad * 2         # w1 K-tiles (streamed)
           + 2 * F_pad * F_pad * 2      # w2
           + 2 * F_pad * H_pad * 2      # fused head weights
           + 2 * tn * H_pad * 4         # output block
           + P * tn * F_pad * 4         # fc1 accumulator scratch
           + (4 << 20))                 # headroom (aux, epilogue temporaries)
    vmem_limit = int(min(max(est, 32 << 20), 64 << 20))

    out = pl.pallas_call(
        _box2fc_kernel,
        out_shape=jax.ShapeDtypeStruct((N_pad, H_pad), jnp.float32),
        grid_spec=pltpu.PrefetchScalarGridSpec(
            num_scalar_prefetch=0,
            grid=grid,
            in_specs=[
                pl.BlockSpec((P, tn, tk), lambda i, k: (0, i, k)),     # roi feats
                pl.BlockSpec((tk, F_pad), lambda i, k: (k, 0)),        # w1 K-tile
                pl.BlockSpec((F_pad, F_pad), lambda i, k: (0, 0)),     # w2
                pl.BlockSpec((F_pad, H_pad), lambda i, k: (0, 0)),     # fused head W
                pl.BlockSpec((3, aux.shape[1]), lambda i, k: (0, 0)),  # packed biases
            ],
            out_specs=pl.BlockSpec((tn, H_pad), lambda i, k: (i, 0)),
            scratch_shapes=[pltpu.VMEM((P * tn, F_pad), jnp.float32)],
        ),
        compiler_params=pltpu.CompilerParams(
            dimension_semantics=("parallel", "arbitrary"),
            vmem_limit_bytes=vmem_limit,
            allow_input_fusion=[True, False, False, False, False],
        ),
    )(x, w1, w2, wh, aux)

    # Padded rows give relu(b1)!=0 downstream -> they MUST be sliced off here.
    loc = out[:N, :4]
    cls = out[:N, 4:4 + num_classes]
    return loc, cls


def box2fc_head(prep, *ps, tile_n=256, tile_k=2048):
    """Mimics Box2FCHead.forward(*ps): each p is (batch*rois, C, H, W)."""
    return _box2fc_forward(tuple(ps), prep["w1"], prep["w2"], prep["wh"],
                           prep["aux"], num_classes=prep["num_classes"],
                           tile_n=tile_n, tile_k=tile_k)


def _fold_bn(gamma, beta, mean, var, eps=1e-5):
    scale = gamma / jnp.sqrt(var + eps)
    bias = beta - mean * scale
    return scale[None, :], bias[None, :]


def make_params(key, in_channels, f_channels, num_classes):
    """Raw (f32) parameters with eval-mode BN expressed as scale/bias."""
    ks = jax.random.split(key, 12)
    # conv 1x1 weights (O, I, 1, 1) stored as (I, O); conv before BN has no bias.
    w1 = jax.random.normal(ks[0], (in_channels, f_channels), jnp.float32) * 0.05
    w2 = jax.random.normal(ks[1], (f_channels, f_channels), jnp.float32) * 0.05
    # head weights: normal(0, 0.001) / normal(0, 0.01) as in weight_init_normal.
    wl = jax.random.normal(ks[2], (f_channels, 4), jnp.float32) * 0.001
    bl = jnp.zeros((1, 4), jnp.float32)
    wc = jax.random.normal(ks[3], (f_channels, num_classes), jnp.float32) * 0.01
    bc = jnp.zeros((1, num_classes), jnp.float32)
    # eval-mode BN parameters (deterministic, non-trivial).
    g1 = 1.0 + 0.1 * jax.random.normal(ks[4], (f_channels,), jnp.float32)
    be1 = 0.1 * jax.random.normal(ks[5], (f_channels,), jnp.float32)
    m1 = 0.1 * jax.random.normal(ks[6], (f_channels,), jnp.float32)
    v1 = 1.0 + 0.1 * jax.random.uniform(ks[7], (f_channels,), jnp.float32)
    g2 = 1.0 + 0.1 * jax.random.normal(ks[8], (f_channels,), jnp.float32)
    be2 = 0.1 * jax.random.normal(ks[9], (f_channels,), jnp.float32)
    m2 = 0.1 * jax.random.normal(ks[10], (f_channels,), jnp.float32)
    v2 = 1.0 + 0.1 * jax.random.uniform(ks[11], (f_channels,), jnp.float32)
    s1, b1 = _fold_bn(g1, be1, m1, v1)
    s2, b2 = _fold_bn(g2, be2, m2, v2)
    return dict(w1=w1, s1=s1, b1=b1, w2=w2, s2=s2, b2=b2,
                wl=wl, bl=bl, wc=wc, bc=bc)


def prepare_params(params, mxu_dtype=jnp.bfloat16):
    """Pack/pad parameters for the kernel: BN scales folded into the weight
    columns (in f32, before the bf16 cast -> exact), weights padded to 128
    multiples, loc/cls head weights fused into one lane-dense block, and the
    three remaining per-channel vectors (b1, b2, head bias) packed into a
    single (3, W) f32 block (one DMA descriptor)."""
    w1 = params["w1"] * params["s1"]        # fold BN1 scale
    w2 = params["w2"] * params["s2"]        # fold BN2 scale
    K, F = w1.shape
    num_classes = params["wc"].shape[1]
    K_pad = _round_up(K, 128)
    F_pad = _round_up(F, 128)
    H = 4 + num_classes
    H_pad = _round_up(H, 128)

    w1p = jnp.zeros((K_pad, F_pad), mxu_dtype).at[:K, :F].set(w1.astype(mxu_dtype))
    w2p = jnp.zeros((F_pad, F_pad), mxu_dtype).at[:F, :F].set(w2.astype(mxu_dtype))
    wh = jnp.concatenate([params["wl"], params["wc"]], axis=1)          # (F, 4+C)
    whp = jnp.zeros((F_pad, H_pad), mxu_dtype).at[:F, :H].set(wh.astype(mxu_dtype))

    W_aux = max(F_pad, H_pad)
    bh = jnp.concatenate([params["bl"], params["bc"]], axis=1)[0]       # (4+C,)
    aux = jnp.zeros((3, W_aux), jnp.float32)
    aux = aux.at[0, :F].set(params["b1"][0])
    aux = aux.at[1, :F].set(params["b2"][0])
    aux = aux.at[2, :H].set(bh)

    return dict(w1=w1p, w2=w2p, wh=whp, aux=aux, num_classes=num_classes)


def _reference_bf16(params, *ps):
    """Pure-JAX reference mirroring the kernel numerics: BN scales folded into
    the weights in f32, bf16 MXU operands, f32 accumulation/epilogue."""
    dt = jnp.bfloat16
    w1 = (params["w1"] * params["s1"]).astype(dt)
    w2 = (params["w2"] * params["s2"]).astype(dt)
    wl = params["wl"].astype(dt)
    wc = params["wc"].astype(dt)
    xs = [p.reshape(p.shape[0], -1).astype(dt) for p in ps]
    hs = [jnp.maximum(jnp.dot(x, w1, preferred_element_type=jnp.float32)
                      + params["b1"], 0.0) for x in xs]
    h = hs[0]
    for hp in hs[1:]:
        h = jnp.maximum(h, hp)
    h2 = jnp.maximum(jnp.dot(h.astype(dt), w2, preferred_element_type=jnp.float32)
                     + params["b2"], 0.0)
    loc = jnp.dot(h2.astype(dt), wl, preferred_element_type=jnp.float32) + params["bl"]
    cls = jnp.dot(h2.astype(dt), wc, preferred_element_type=jnp.float32) + params["bc"]
    return loc, cls


def _reference_f32(params, *ps):
    xs = [p.reshape(p.shape[0], -1) for p in ps]
    hs = [jnp.maximum(x @ params["w1"] * params["s1"] + params["b1"], 0.0) for x in xs]
    h = hs[0]
    for hp in hs[1:]:
        h = jnp.maximum(h, hp)
    h2 = jnp.maximum(h @ params["w2"] * params["s2"] + params["b2"], 0.0)
    return h2 @ params["wl"] + params["bl"], h2 @ params["wc"] + params["bc"]


if __name__ == "__main__":
    key = jax.random.PRNGKey(0)
    # batch*rois = 40 -> exercises row padding and a 2-step parallel row axis;
    # in_channels = 2*14*14 = 392 -> K_pad = 512, tile_k=256 -> 2-step K axis
    # (exercises the fc1 accumulator path).
    N, C, Hs, Ws = 40, 2, 14, 14
    f_channels = 128
    num_classes = 8
    in_channels = C * Hs * Ws

    kp, k0, k1 = jax.random.split(key, 3)
    params = make_params(kp, in_channels, f_channels, num_classes)
    prep = prepare_params(params)
    p0 = jax.random.normal(k0, (N, C, Hs, Ws), jnp.float32)
    p1 = jax.random.normal(k1, (N, C, Hs, Ws), jnp.float32)

    loc_p, cls_p = box2fc_head(prep, p0, p1, tile_n=256, tile_k=256)
    loc_p, cls_p = jax.block_until_ready((loc_p, cls_p))
    assert loc_p.shape == (N, 4) and cls_p.shape == (N, num_classes)

    # Tight check vs. a reference using the same folded-bf16 / f32-epilogue path.
    loc_r, cls_r = _reference_bf16(params, p0, p1)
    assert jnp.allclose(loc_p, loc_r, atol=2e-3, rtol=2e-3), \
        float(jnp.max(jnp.abs(loc_p - loc_r)))
    assert jnp.allclose(cls_p, cls_r, atol=2e-3, rtol=2e-3), \
        float(jnp.max(jnp.abs(cls_p - cls_r)))

    # Loose check vs. full-f32 module semantics (bf16 quantization error only).
    loc_f, cls_f = _reference_f32(params, p0, p1)
    assert jnp.allclose(loc_p, loc_f, atol=3e-2, rtol=3e-2)
    assert jnp.allclose(cls_p, cls_f, atol=3e-2, rtol=3e-2)

    print("KERNEL_OK")
</pallas_src>

<mosaic_0001>
module attributes {stable_mosaic.version = 11 : i64} {
  func.func @_box2fc_kernel(%arg0: i32, %arg1: i32, %arg2: memref<2x32x256xbf16, #tpu.memory_space<vmem>>, %arg3: memref<256x128xbf16, #tpu.memory_space<vmem>>, %arg4: memref<128x128xbf16, #tpu.memory_space<vmem>>, %arg5: memref<128x128xbf16, #tpu.memory_space<vmem>>, %arg6: memref<3x128xf32, #tpu.memory_space<vmem>>, %arg7: memref<32x128xf32, #tpu.memory_space<vmem>>, %arg8: memref<64x128xf32, #tpu.memory_space<vmem>>) attributes {dimension_semantics = [#tpu.dimension_semantics<parallel>, #tpu.dimension_semantics<arbitrary>], iteration_bounds = array<i64: 2, 2>, scalar_prefetch = 0 : i64, scratch_operands = 1 : i64, tpu.core_type = #tpu.core_type<tc>, window_params = [{transform_indices = @transform_0, window_bounds = array<i64: 2, 32, 256>}, {transform_indices = @transform_1, window_bounds = array<i64: 256, 128>}, {pipeline_mode = #tpu.pipeline_mode<synchronous>, transform_indices = @transform_2, window_bounds = array<i64: 128, 128>}, {pipeline_mode = #tpu.pipeline_mode<synchronous>, transform_indices = @transform_3, window_bounds = array<i64: 128, 128>}, {pipeline_mode = #tpu.pipeline_mode<synchronous>, transform_indices = @transform_4, window_bounds = array<i64: 3, 128>}, {transform_indices = @transform_5, window_bounds = array<i64: 32, 128>}]} {
    %c0_i32 = arith.constant 0 : i32
    %0 = arith.cmpi eq, %arg1, %c0_i32 : i32
    %1 = arith.extui %0 : i1 to i32
    %c0_i32_0 = arith.constant 0 : i32
    %2 = arith.cmpi ne, %1, %c0_i32_0 : i32
    scf.if %2 {
      %cst_10 = arith.constant 0.000000e+00 : f32
      %13 = vector.broadcast %cst_10 : f32 to vector<64x128xf32>
      %c0_11 = arith.constant 0 : index
      %c0_12 = arith.constant 0 : index
      %14 = vector.load %arg8[%c0_11, %c0_12] : memref<64x128xf32, #tpu.memory_space<vmem>>, vector<64x128xf32>
      tpu.vector_store %arg8[%c0_11, %c0_12], %13 {strides = array<i32>} : memref<64x128xf32, #tpu.memory_space<vmem>>, vector<64x128xf32>,
    } else {
    }
    %c0 = arith.constant 0 : index
    %c0_1 = arith.constant 0 : index
    %c0_2 = arith.constant 0 : index
    %3 = vector.load %arg2[%c0, %c0_1, %c0_2] : memref<2x32x256xbf16, #tpu.memory_space<vmem>>, vector<2x32x256xbf16>
    %4 = vector.shape_cast %3 : vector<2x32x256xbf16> to vector<64x256xbf16>
    %c0_3 = arith.constant 0 : index
    %c0_4 = arith.constant 0 : index
    %5 = vector.load %arg8[%c0_3, %c0_4] : memref<64x128xf32, #tpu.memory_space<vmem>>, vector<64x128xf32>
    %c0_5 = arith.constant 0 : index
    %c0_6 = arith.constant 0 : index
    %6 = vector.load %arg3[%c0_5, %c0_6] : memref<256x128xbf16, #tpu.memory_space<vmem>>, vector<256x128xbf16>
    %cst = arith.constant dense<0.000000e+00> : vector<64x128xf32>
    %7 = tpu.matmul %4, %6, %cst {dimension_numbers = #tpu.dot_dimension_numbers<[1], [0], [0], [1], [0, 0, 1, 1], [], []>} : vector<64x256xbf16>, vector<256x128xbf16>, vector<64x128xf32> -> vector<64x128xf32>
    %8 = arith.addf %5, %7 : vector<64x128xf32>
    %c0_7 = arith.constant 0 : index
    %c0_8 = arith.constant 0 : index
    %9 = vector.load %arg8[%c0_7, %c0_8] : memref<64x128xf32, #tpu.memory_space<vmem>>, vector<64x128xf32>
    tpu.vector_store %arg8[%c0_7, %c0_8], %8 {strides = array<i32>} : memref<64x128xf32, #tpu.memory_space<vmem>>, vector<64x128xf32>,
    %c1_i32 = arith.constant 1 : i32
    %10 = arith.cmpi eq, %arg1, %c1_i32 : i32
    %11 = arith.extui %10 : i1 to i32
    %c0_i32_9 = arith.constant 0 : i32
    %12 = arith.cmpi ne, %11, %c0_i32_9 : i32
    scf.if %12 {
      %c0_10 = arith.constant 0 : index
      %c0_11 = arith.constant 0 : index
      %13 = vector.load %arg6[%c0_10, %c0_11] : memref<3x128xf32, #tpu.memory_space<vmem>>, vector<1x128xf32>
      %c1 = arith.constant 1 : index
      %c0_12 = arith.constant 0 : index
      %14 = vector.load %arg6[%c1, %c0_12] : memref<3x128xf32, #tpu.memory_space<vmem>>, vector<1x128xf32>
      %c2 = arith.constant 2 : index
      %c0_13 = arith.constant 0 : index
      %15 = vector.load %arg6[%c2, %c0_13] : memref<3x128xf32, #tpu.memory_space<vmem>>, vector<1x128xf32>
      %c0_14 = arith.constant 0 : index
      %c0_15 = arith.constant 0 : index
      %16 = vector.load %arg8[%c0_14, %c0_15] : memref<64x128xf32, #tpu.memory_space<vmem>>, vector<64x128xf32>
      %17 = vector.broadcast %13 : vector<1x128xf32> to vector<64x128xf32>
      %18 = arith.addf %16, %17 : vector<64x128xf32>
      %cst_16 = arith.constant 0.000000e+00 : f32
      %19 = vector.broadcast %cst_16 : f32 to vector<64x128xf32>
      %20 = arith.maximumf %18, %19 : vector<64x128xf32>
      %21 = vector.extract_strided_slice %20 {offsets = [0, 0], sizes = [32, 128], strides = [1, 1]} : vector<64x128xf32> to vector<32x128xf32>
      %22 = vector.extract_strided_slice %20 {offsets = [32, 0], sizes = [32, 128], strides = [1, 1]} : vector<64x128xf32> to vector<32x128xf32>
      %23 = arith.maximumf %21, %22 : vector<32x128xf32>
      %24 = arith.truncf %23 : vector<32x128xf32> to vector<32x128xbf16>
      %c0_17 = arith.constant 0 : index
      %c0_18 = arith.constant 0 : index
      %25 = vector.load %arg4[%c0_17, %c0_18] : memref<128x128xbf16, #tpu.memory_space<vmem>>, vector<128x128xbf16>
      %cst_19 = arith.constant dense<0.000000e+00> : vector<32x128xf32>
      %26 = tpu.matmul %24, %25, %cst_19 {dimension_numbers = #tpu.dot_dimension_numbers<[1], [0], [0], [1], [0, 0, 1, 1], [], []>} : vector<32x128xbf16>, vector<128x128xbf16>, vector<32x128xf32> -> vector<32x128xf32>
      %27 = vector.broadcast %14 : vector<1x128xf32> to vector<32x128xf32>
      %28 = arith.addf %26, %27 : vector<32x128xf32>
      %cst_20 = arith.constant 0.000000e+00 : f32
      %29 = vector.broadcast %cst_20 : f32 to vector<32x128xf32>
      %30 = arith.maximumf %28, %29 : vector<32x128xf32>
      %31 = arith.truncf %30 : vector<32x128xf32> to vector<32x128xbf16>
      %c0_21 = arith.constant 0 : index
      %c0_22 = arith.constant 0 : index
      %32 = vector.load %arg5[%c0_21, %c0_22] : memref<128x128xbf16, #tpu.memory_space<vmem>>, vector<128x128xbf16>
      %cst_23 = arith.constant dense<0.000000e+00> : vector<32x128xf32>
      %33 = tpu.matmul %31, %32, %cst_23 {dimension_numbers = #tpu.dot_dimension_numbers<[1], [0], [0], [1], [0, 0, 1, 1], [], []>} : vector<32x128xbf16>, vector<128x128xbf16>, vector<32x128xf32> -> vector<32x128xf32>
      %34 = vector.broadcast %15 : vector<1x128xf32> to vector<32x128xf32>
      %35 = arith.addf %33, %34 : vector<32x128xf32>
      %c0_24 = arith.constant 0 : index
      %c0_25 = arith.constant 0 : index
      %36 = vector.load %arg7[%c0_24, %c0_25] : memref<32x128xf32, #tpu.memory_space<vmem>>, vector<32x128xf32>
      tpu.vector_store %arg7[%c0_24, %c0_25], %35 {strides = array<i32>} : memref<32x128xf32, #tpu.memory_space<vmem>>, vector<32x128xf32>,
    } else {
    }
    return
  }
  func.func @transform_0(%arg0: i32, %arg1: i32) -> (i32, i32, i32) {
    %c0_i32 = arith.constant 0 : i32
    %c0_i32_0 = arith.constant 0 : i32
    return %c0_i32, %arg0, %arg1 : i32, i32, i32
  }
  func.func @transform_1(%arg0: i32, %arg1: i32) -> (i32, i32) {
    %c0_i32 = arith.constant 0 : i32
    %c0_i32_0 = arith.constant 0 : i32
    return %arg1, %c0_i32 : i32, i32
  }
  func.func @transform_2(%arg0: i32, %arg1: i32) -> (i32, i32) {
    %c0_i32 = arith.constant 0 : i32
    %c0_i32_0 = arith.constant 0 : i32
    %c0_i32_1 = arith.constant 0 : i32
    return %c0_i32, %c0_i32_0 : i32, i32
  }
  func.func @transform_3(%arg0: i32, %arg1: i32) -> (i32, i32) {
    %c0_i32 = arith.constant 0 : i32
    %c0_i32_0 = arith.constant 0 : i32
    %c0_i32_1 = arith.constant 0 : i32
    return %c0_i32, %c0_i32_0 : i32, i32
  }
  func.func @transform_4(%arg0: i32, %arg1: i32) -> (i32, i32) {
    %c0_i32 = arith.constant 0 : i32
    %c0_i32_0 = arith.constant 0 : i32
    %c0_i32_1 = arith.constant 0 : i32
    return %c0_i32, %c0_i32_0 : i32, i32
  }
  func.func @transform_5(%arg0: i32, %arg1: i32) -> (i32, i32) {
    %c0_i32 = arith.constant 0 : i32
    %c0_i32_0 = arith.constant 0 : i32
    return %arg0, %c0_i32 : i32, i32
  }
}

</mosaic_0001>

<bundles_post_ra>
// kernel: _box2fc_forward.1
= control target key start
LH: loop header
LB: loop body
LE: loop exit
PB: predicated region body
PF: predicated region fallthrough
CT: control target
= control target key end

     0   :  { %s1349_s18 = smov 0   ;;  %s1351_s19 = smov 0   ;;  %s1534_s0 = inlined_call_operand.vmem [shape: bf16[2,64,512], index: 0, kind: input, shape index: {}]   ;;  %s1535_s1 = inlined_call_operand.vmem [shape: bf16[512,128], index: 1, kind: input, shape index: {}]   ;;  %s1536_s2 = inlined_call_operand.vmem [shape: bf16[128,128], index: 2, kind: input, shape index: {}]   ;;  %s1537_s3 = inlined_call_operand.vmem [shape: bf16[128,128], index: 3, kind: input, shape index: {}]   ;;  %s1538_s4 = inlined_call_operand.vmem [shape: f32[3,128], index: 4, kind: input, shape index: {}]   ;;  %s1539_s5 = inlined_call_operand.vmem [shape: f32[64,128], index: 5, kind: output, shape index: {}]  }
   0x1   :  { %s1353_s20 = smov 0   ;;  %s1355_s21 = smov 0  }
   0x2   :  { %s1357_s22 = smov 0   ;;  %s1359_s23 = smov 0  }
   0x3   :  { %s1361_s24 = smov 0  }
   0x4 LB: > { %s24_s25 = sadd.s32 1, %s1308_s22  ;;  %s27_s26 = sadd.s32 1, %s1312_s23  ;;  %s1316_s24 = sphi %s1361_s24, %s15_s24   ;;  %s1312_s23 = sphi %s1359_s23, %s1545_s23   ;;  %s1308_s22 = sphi %s1357_s22, %s1544_s22   ;;  %s1304_s21 = sphi %s1355_s21, %s1543_s21   ;;  %s1300_s20 = sphi %s1353_s20, %s1542_s20   ;;  %s1296_s19 = sphi %s1351_s19, %s1541_s19   ;;  %s1292_s18 = sphi %s1349_s18, %s1540_s18  }
   0x5   : > { %p25_p0 = scmp.ge.s32.totalorder %s24_s25, 2  ;;  %p43_p1 = scmp.ne.s32.totalorder %s1296_s19, %s1292_s18 }
   0x6   : > { %p44_p2 = scmp.eq.s32.totalorder %s1316_s24, 0  ;;  %s36_s30 = sadd.s32 1, %s1296_s19 }
   0x7   : > { %s1547_s25 = smov (%p25_p0, %s24_s25), 0  ;;  %s1549_s26 = smov (!%p25_p0, %s27_s26), %s1312_s23 }
   0x8   : > { %p45_p3 = por %p44_p2, %p43_p1  ;;  %p29_p4 = scmp.ge.s32.totalorder %s1549_s26, 2 }
   0x9   : > { %s32_s27 = ssub.s32 %s1308_s22, %s1547_s25  ;;  %p985_p6 = scmp.ge.s32.totalorder %s1316_s24, 4 }
   0xa   : > { %s1551_s26 = smov (%p29_p4, %s1549_s26), 0 }
   0xb   : > { %s31_s28 = ssub.s32 %s1312_s23, %s1551_s26  ;;  %193 = sbr.rel (%p985_p6) target bundleno = 29 (0x1d), region = 28 }
   0xc   : > { %s33_s29 = sor.u32 %s32_s27, %s31_s28 }
   0xd   : > { %p34_p5 = scmp.eq.s32.totalorder %s33_s29, 0 }
   0xf   : > { %s1400_s6 = scalar_select %p34_p5, %s1296_s19, %s36_s30  }
  0x12   : > { %196 = sbr.rel (!%p45_p3) target bundleno = 29 (0x1d), region = 32  ;;  %s198_s7 = sand.u32 (%p45_p3), 1, %s1296_s19  }
  0x13   : > { %s988_s8 = sshll.u32 (%p45_p3), %s1308_s22, 1  ;;  %s986_s9 = sshll.u32 (%p45_p3), %s198_s7, 6 }
  0x14   : > { %s1044_s10 = sshll.u32 (%p45_p3), %s1312_s23, 4  ;;  %s200_s16 = scalar_lea.vmem (%p45_p3), [#allocation3], %s986_s9 }
  0x15   : > { %s204_s11 = sadd.s32 (%p45_p3), %s1044_s10, %s988_s8 }
  0x16   : > { %s990_s12 = sshll.u32 (%p45_p3), %s204_s11, 2 }
  0x17   : > { %s206_s15 = scalar_lea.vmem (%p45_p3), %s1534_s0, %s990_s12 }
  0x18   : > { %v248_v0 = vld [vmem:[%s206_s15] sm:$0xff] (%p45_p3)  ;;  %v250_v1 = vld [vmem:[%s206_s15 + $0x10] sm:$0xff] (%p45_p3) }
  0x19   : > { %v252_v2 = vld [vmem:[%s206_s15 + $0x20] sm:$0xff]  ;;  %249 = vst [vmem:[%s200_s16] sm:$0xff] %v248_v0  ;;  %251 = vst [vmem:[%s200_s16 + $0x8] sm:$0xff] %v250_v1  ;;  %v254_v3 = vld [vmem:[%s206_s15 + $0x30] sm:$0xff] }
  0x1a   : > { %253 = vst [vmem:[%s200_s16 + $0x10] sm:$0xff] %v252_v2  ;;  %v256_v4 = vld [vmem:[%s206_s15 + $0x80] sm:$0xff]  ;;  %v258_v5 = vld [vmem:[%s206_s15 + $0x90] sm:$0xff]  ;;  %255 = vst [vmem:[%s200_s16 + $0x18] sm:$0xff] %v254_v3 }
  0x1b   : > { %257 = vst [vmem:[%s200_s16 + $0x20] sm:$0xff] %v256_v4  ;;  %259 = vst [vmem:[%s200_s16 + $0x28] sm:$0xff] %v258_v5  ;;  %v260_v6 = vld [vmem:[%s206_s15 + $0xa0] sm:$0xff]  ;;  %v262_v7 = vld [vmem:[%s206_s15 + $0xb0] sm:$0xff] }
  0x1c   : > { %261 = vst [vmem:[%s200_s16 + $0x30] sm:$0xff] %v260_v6  ;;  %263 = vst [vmem:[%s200_s16 + $0x38] sm:$0xff] %v262_v7 }
  0x1d PF: > { %p991_p7 = scmp.ge.s32.totalorder %s1316_s24, 1  ;;  %p277_p8 = scmp.lt.s32.totalorder %s1316_s24, 5 }
  0x1f   : > { %p278_p9 = pnand %p991_p7, %p277_p8 }
  0x20   : > { %s284_s17 = sand.u32 (!%p278_p9), 1, %s1292_s18   ;;  %s993_s27 = sshll.u32 (!%p278_p9), %s1300_s20, 5 }
  0x21   : > { %281 = sbr.rel (%p278_p9) target bundleno = 767 (0x2ff), region = 74  ;;  %s992_s28 = sshll.u32 (!%p278_p9), %s284_s17, 6 }
  0x22   : > { %p319_p10 = scmp.lt.s32.totalorder (!%p278_p9), %s993_s27, 63  ;;  %s995_s29 = sshll.u32 (!%p278_p9), %s1304_s21, 2 }
  0x23   : > { %p325_p11 = scmp.lt.s32.totalorder (!%p278_p9), %s995_s29, 7  ;;  %s1424_s18 = scalar_lea.vmem (!%p278_p9), [#allocation3], %s992_s28 }
  0x24   : > { %p997_p12 = scmp.ne.s32.totalorder (!%p278_p9), %s1300_s20, 0 }
  0x28   : > { %s1553_s27 = smov (!%p319_p10, %s993_s27), 63  ;;  %s1555_s29 = smov (!%p325_p11, %s995_s29), 7 }
  0x29   : > { %s994_s30 = sshll.u32 %s1553_s27, 2  ;;  %s996_s10 = sshll.u32 %s1555_s29, 3  ;;  %v1318_v8 = vmov (!%p997_p12), 0.0  }
  0x2a   : > { %s1417_s9 = scalar_lea.vmem %s1535_s1, %s994_s30  ;;  %s1422_s13 = scalar_lea.vmem %s1539_s5, %s996_s10  ;;  %335 = vst [vmem:[#allocation2] sm:$0xff] (!%p997_p12), %v1318_v8  ;;  %336 = vst [vmem:[#allocation2 + $0x8] sm:$0xff] (!%p997_p12), %v1318_v8 }
  0x2b   : > { %334 = sbr.rel (%p997_p12) target bundleno = 50 (0x32), region = 82  ;;  %337 = vst [vmem:[#allocation2 + $0x10] sm:$0xff] (!%p997_p12), %v1318_v8  ;;  %338 = vst [vmem:[#allocation2 + $0x18] sm:$0xff] (!%p997_p12), %v1318_v8 }
  0x2c   : > { %339 = vst [vmem:[#allocation2 + $0x20] sm:$0xff] (!%p997_p12), %v1318_v8  ;;  %340 = vst [vmem:[#allocation2 + $0x28] sm:$0xff] (!%p997_p12), %v1318_v8 }
  0x2d   : > { %341 = vst [vmem:[#allocation2 + $0x30] sm:$0xff] (!%p997_p12), %v1318_v8  ;;  %342 = vst [vmem:[#allocation2 + $0x38] sm:$0xff] (!%p997_p12), %v1318_v8 }
  0x32 PF: > { %v1218_v9 = vld [vmem:[%s1417_s9 + $0x40] sm:$0xff]   ;;  %v1220_v11 = vld [vmem:[%s1417_s9 + $0x48] sm:$0xff]   ;;  %v1222_v13 = vld [vmem:[%s1417_s9 + $0x50] sm:$0xff]   ;;  %p1022_p13 = scmp.ne.s32.totalorder %s1300_s20, 1 }
  0x33   : > { %v1219_v10 = vld [vmem:[%s1417_s9] sm:$0xff]   ;;  %1045 = vmatprep.subr.bf16.mxu0 %v1218_v9  ;;  %1145 = vmatprep.subr.bf16.mxu1 %v1218_v9  ;;  %v1221_v12 = vld [vmem:[%s1417_s9 + $0x8] sm:$0xff]   ;;  %v1223_v14 = vld [vmem:[%s1417_s9 + $0x10] sm:$0xff]  }
  0x34   : > { %1046 = vmatpush3.bf16.msra.mxu0 %v1219_v10  ;;  %1153 = vmatpush3.bf16.msra.mxu1 %v1219_v10  ;;  %v1224_v15 = vld [vmem:[%s1417_s9 + $0x58] sm:$0xff]   ;;  %v1226_v17 = vld [vmem:[%s1417_s9 + $0x60] sm:$0xff]   ;;  %v1228_v19 = vld [vmem:[%s1417_s9 + $0x68] sm:$0xff]  }
  0x35   : > { %1047 = vmatprep.subr.bf16.mxu0 %v1220_v11  ;;  %1146 = vmatprep.subr.bf16.mxu1 %v1220_v11  ;;  %v1225_v16 = vld [vmem:[%s1417_s9 + $0x18] sm:$0xff]   ;;  %v1227_v18 = vld [vmem:[%s1417_s9 + $0x20] sm:$0xff]   ;;  %v1229_v22 = vld [vmem:[%s1417_s9 + $0x28] sm:$0xff]  }
  0x36   : > { %v1236_v20 = vld [vmem:[%s1424_s18 + $0x4] ss:$8 sps:$4 sm:$0xff]   ;;  %v1230_v23 = vld [vmem:[%s1417_s9 + $0x70] sm:$0xff]   ;;  %v1232_v25 = vld [vmem:[%s1417_s9 + $0x78] sm:$0xff]  }
  0x37   : > { %v1239_v21 = vld [vmem:[%s1424_s18 + $0x24] ss:$8 sps:$4 sm:$0xff]   ;;  %559 = vmatprep.mubr.bf16.mxu0 %v1236_v20  ;;  %v1231_v24 = vld [vmem:[%s1417_s9 + $0x30] sm:$0xff]   ;;  %v1233_v26 = vld [vmem:[%s1417_s9 + $0x38] sm:$0xff]  }
  0x38   : > { %1048 = vmatpush3.bf16.msra.mxu0 %v1221_v12  ;;  %1154 = vmatpush3.bf16.msra.mxu1 %v1221_v12  ;;  %v1234_v27 = vld [vmem:[%s1424_s18] ss:$8 sps:$4 sm:$0xff]   ;;  %v1240_v29 = vld [vmem:[%s1424_s18 + $0x14] ss:$8 sps:$4 sm:$0xff]   ;;  %v1244_v31 = vld [vmem:[%s1424_s18 + $0x10] ss:$8 sps:$4 sm:$0xff]  }
  0x39   : > { %1049 = vmatprep.subr.bf16.mxu0 %v1222_v13  ;;  %1147 = vmatprep.subr.bf16.mxu1 %v1222_v13  ;;  %v1237_v28 = vld [vmem:[%s1424_s18 + $0x20] ss:$8 sps:$4 sm:$0xff]   ;;  %v1242_v30 = vld [vmem:[%s1424_s18 + $0x34] ss:$8 sps:$4 sm:$0xff]   ;;  %v1245_v32 = vld [vmem:[%s1424_s18 + $0x30] ss:$8 sps:$4 sm:$0xff]  }
  0x3a   : > { %575 = vmatprep.mubr.bf16.mxu1 %v1239_v21  ;;  %v351_v35 = vld [vmem:[#allocation2] sm:$0xff]  ;;  %v352_v43 = vld [vmem:[#allocation2 + $0x8] sm:$0xff]  ;;  %v353_v55 = vld [vmem:[#allocation2 + $0x10] sm:$0xff] }
  0x3b   : > { %v355_v37 = vld [vmem:[#allocation2 + $0x20] sm:$0xff]  ;;  %v356_v45 = vld [vmem:[#allocation2 + $0x28] sm:$0xff]  ;;  %v357_v57 = vld [vmem:[#allocation2 + $0x30] sm:$0xff] }
  0x3c   : > { %1050 = vmatpush3.bf16.msra.mxu0 %v1223_v14  ;;  %1155 = vmatpush3.bf16.msra.mxu1 %v1223_v14  ;;  %v354_v63 = vld [vmem:[#allocation2 + $0x18] sm:$0xff]  ;;  %v1246_v9 = vld [vmem:[%s1536_s2] sm:$0xff] (!%p1022_p13)   ;;  %v1247_v10 = vld [vmem:[%s1536_s2 + $0x8] sm:$0xff] (!%p1022_p13)  }
  0x3d   : > { %1051 = vmatprep.subr.bf16.mxu0 %v1224_v15  ;;  %1148 = vmatprep.subr.bf16.mxu1 %v1224_v15  ;;  %v358_v1 = vld [vmem:[#allocation2 + $0x38] sm:$0xff]  ;;  %v1248_v11 = vld [vmem:[%s1536_s2 + $0x10] sm:$0xff] (!%p1022_p13)   ;;  %v1023_v13 = vld [vmem:[%s1538_s4] ss:$0 sm:$0xff] (!%p1022_p13) }
  0x3e   : > { %v1249_v12 = vld [vmem:[%s1536_s2 + $0x18] sm:$0xff] (!%p1022_p13)  }
  0x40   : > { %1052 = vmatpush3.bf16.msra.mxu0 %v1225_v16  ;;  %1156 = vmatpush3.bf16.msra.mxu1 %v1225_v16 }
  0x41   : > { %1053 = vmatprep.subr.bf16.mxu0 %v1226_v17  ;;  %1149 = vmatprep.subr.bf16.mxu1 %v1226_v17 }
  0x44   : > { %1054 = vmatpush3.bf16.msra.mxu0 %v1227_v18  ;;  %1157 = vmatpush3.bf16.msra.mxu1 %v1227_v18 }
  0x45   : > { %1055 = vmatprep.subr.bf16.mxu0 %v1228_v19  ;;  %1150 = vmatprep.subr.bf16.mxu1 %v1228_v19 }
  0x48   : > { %1056 = vmatpush3.bf16.msra.mxu0 %v1229_v22  ;;  %1158 = vmatpush3.bf16.msra.mxu1 %v1229_v22 }
  0x49   : > { %1057 = vmatprep.subr.bf16.mxu0 %v1230_v23  ;;  %1151 = vmatprep.subr.bf16.mxu1 %v1230_v23 }
  0x4c   : > { %1058 = vmatpush3.bf16.msra.mxu0 %v1231_v24  ;;  %1159 = vmatpush3.bf16.msra.mxu1 %v1231_v24  ;;  %v1250_v24 = vld [vmem:[%s1536_s2 + $0x20] sm:$0xff] (!%p1022_p13)  }
  0x4d   : > { %1059 = vmatprep.subr.bf16.mxu0 %v1232_v25  ;;  %1152 = vmatprep.subr.bf16.mxu1 %v1232_v25 }
  0x50   : > { %1060 = vmatpush3.bf16.msra.mxu0 %v1233_v26  ;;  %1160 = vmatpush3.bf16.msra.mxu1 %v1233_v26 }
  0x51   : > { %1105 = vmatprep.subr.bf16.mxu0 (!%p1022_p13), %v1246_v9 }
  0x53   : > { %560 = vmatmul.mubr.bf16.vlgmr.msra.gmra.mrb[0].mxu0 %v1234_v27  ;;  %576 = vmatmul.mubr.bf16.vlgmr.msra.gmra.mrb[0].mxu1 %v1237_v28  ;;  %v1254_v27 = vld [vmem:[%s1537_s3] sm:$0xff] (!%p1022_p13)  }
  0x54   : > { %567 = vmatprep.mubr.bf16.mxu0 %v1240_v29  ;;  %583 = vmatprep.mubr.bf16.mxu1 %v1242_v30 }
  0x55   : > { %1106 = vmatpush3.bf16.msra.mxu0 (!%p1022_p13), %v1246_v9  ;;  %1125 = vmatprep.subr.bf16.mxu1 (!%p1022_p13), %v1254_v27 }
  0x56   : > { %1107 = vmatprep.subr.bf16.mxu0 (!%p1022_p13), %v1247_v10  ;;  %1126 = vmatpush3.bf16.msra.mxu1 (!%p1022_p13), %v1254_v27 }
  0x59   : > { %1108 = vmatpush3.bf16.msra.mxu0 (!%p1022_p13), %v1247_v10 }
  0x5a   : > { %1109 = vmatprep.subr.bf16.mxu0 (!%p1022_p13), %v1248_v11 }
  0x5b   : > { %568 = vmatmul.mubr.bf16.gmra.mrb[4].mxu0 %v1244_v31  ;;  %584 = vmatmul.mubr.bf16.gmra.mrb[4].mxu1 %v1245_v32  ;;  %v1255_v31 = vld [vmem:[%s1537_s3 + $0x8] sm:$0xff] (!%p1022_p13)  }
  0x5c   : > { %v1251_v32 = vld [vmem:[%s1536_s2 + $0x28] sm:$0xff] (!%p1022_p13)   ;;  %1127 = vmatprep.subr.bf16.mxu1 (!%p1022_p13), %v1255_v31 }
  0x5d   : > { %1110 = vmatpush3.bf16.msra.mxu0 (!%p1022_p13), %v1248_v11  ;;  %1128 = vmatpush3.bf16.msra.mxu1 (!%p1022_p13), %v1255_v31 }
  0x5e   : > { %1111 = vmatprep.subr.bf16.mxu0 (!%p1022_p13), %v1249_v12 }
  0x61   : > { %1112 = vmatpush3.bf16.msra.mxu0 (!%p1022_p13), %v1249_v12 }
  0x62   : > { %1113 = vmatprep.subr.bf16.mxu0 (!%p1022_p13), %v1250_v24 }
  0x65   : > { %1114 = vmatpush3.bf16.msra.mxu0 (!%p1022_p13), %v1250_v24 }
  0x66   : > { %1115 = vmatprep.subr.bf16.mxu0 (!%p1022_p13), %v1251_v32 }
  0x69   : > { %1116 = vmatpush3.bf16.msra.mxu0 (!%p1022_p13), %v1251_v32 }
 0x126   : > { %v1061_v33 = vpop.f32.mrb[0].mxu0  ;;  %v1073_v34 = vpop.f32.mrb[0].mxu1 }
 0x127   : > { %v1062_v36 = vpop.f32.mrb[1].mxu0  ;;  %v1074_v38 = vpop.f32.mrb[1].mxu1 }
 0x128   : > { %v1063_v39 = vadd.f32 %v1062_v36, %v1061_v33  ;;  %v1075_v40 = vadd.f32 %v1074_v38, %v1073_v34  ;;  %v1064_v41 = vpop.f32.mrb[2].mxu0  ;;  %v1076_v42 = vpop.f32.mrb[2].mxu1 }
 0x129   : > { %v1065_v44 = vpop.f32.mrb[3].mxu0  ;;  %v1077_v46 = vpop.f32.mrb[3].mxu1 }
 0x12a   : > { %v592_v47 = vadd.f32 %v1063_v39, %v351_v35  ;;  %v596_v48 = vadd.f32 %v1075_v40, %v355_v37  ;;  %v1066_v49 = vadd.f32 %v1065_v44, %v1064_v41  ;;  %v1078_v50 = vadd.f32 %v1077_v46, %v1076_v42  ;;  %v1256_v37 = vld [vmem:[%s1537_s3 + $0x10] sm:$0xff] (!%p1022_p13)  }
 0x12b   : > { %v1252_v42 = vld [vmem:[%s1536_s2 + $0x30] sm:$0xff] (!%p1022_p13)   ;;  %1129 = vmatprep.subr.bf16.mxu1 (!%p1022_p13), %v1256_v37 }
 0x12c   : > { %600 = vst [vmem:[#allocation2] sm:$0xff] %v592_v47  ;;  %604 = vst [vmem:[#allocation2 + $0x20] sm:$0xff] %v596_v48  ;;  %v593_v51 = vadd.f32 %v1066_v49, %v352_v43  ;;  %v597_v52 = vadd.f32 %v1078_v50, %v356_v45  ;;  %v1257_v43 = vld [vmem:[%s1537_s3 + $0x18] sm:$0xff] (!%p1022_p13)   ;;  %1130 = vmatpush3.bf16.msra.mxu1 (!%p1022_p13), %v1256_v37  ;;  %1117 = vmatprep.subr.bf16.mxu0 (!%p1022_p13), %v1252_v42  ;;  %v1258_v49 = vld [vmem:[%s1537_s3 + $0x20] sm:$0xff] (!%p1022_p13)  }
 0x12d   : > { %v1253_v48 = vld [vmem:[%s1536_s2 + $0x38] sm:$0xff] (!%p1022_p13)   ;;  %1131 = vmatprep.subr.bf16.mxu1 (!%p1022_p13), %v1257_v43  ;;  %1118 = vmatpush3.bf16.msra.mxu0 (!%p1022_p13), %v1252_v42 }
 0x12e   : > { %601 = vst [vmem:[#allocation2 + $0x8] sm:$0xff] %v593_v51  ;;  %605 = vst [vmem:[#allocation2 + $0x28] sm:$0xff] %v597_v52  ;;  %v1067_v53 = vpop.f32.mrb[4].mxu0  ;;  %v1079_v54 = vpop.f32.mrb[4].mxu1  ;;  %1119 = vmatprep.subr.bf16.mxu0 (!%p1022_p13), %v1253_v48  ;;  %v1259_v52 = vld [vmem:[%s1537_s3 + $0x28] sm:$0xff] (!%p1022_p13)  }
 0x12f   : > { %v1068_v56 = vpop.f32.mrb[5].mxu0  ;;  %v1080_v58 = vpop.f32.mrb[5].mxu1 }
 0x130   : > { %v1069_v59 = vadd.f32 %v1068_v56, %v1067_v53  ;;  %v1081_v60 = vadd.f32 %v1080_v58, %v1079_v54  ;;  %v1070_v61 = vpop.f32.mrb[6].mxu0  ;;  %v1082_v62 = vpop.f32.mrb[6].mxu1  ;;  %611 = sbr.rel (%p1022_p13) target bundleno = 767 (0x2ff), region = 86  ;;  %1132 = vmatpush3.bf16.msra.mxu1 (!%p1022_p13), %v1257_v43  ;;  %v1260_v54 = vld [vmem:[%s1537_s3 + $0x30] sm:$0xff] (!%p1022_p13)   ;;  %v1024_v56 = vld [vmem:[%s1538_s4 + $0x1] ss:$0 sm:$0xff] (!%p1022_p13) }
 0x131   : > { %v1071_v0 = vpop.f32.mrb[7].mxu0  ;;  %v1083_v2 = vpop.f32.mrb[7].mxu1  ;;  %1133 = vmatprep.subr.bf16.mxu1 (!%p1022_p13), %v1258_v49  ;;  %1120 = vmatpush3.bf16.msra.mxu0 (!%p1022_p13), %v1253_v48 }
 0x132   : > { %v594_v3 = vadd.f32 %v1069_v59, %v353_v55  ;;  %v598_v4 = vadd.f32 %v1081_v60, %v357_v57  ;;  %v1072_v5 = vadd.f32 %v1071_v0, %v1070_v61  ;;  %v1084_v6 = vadd.f32 %v1083_v2, %v1082_v62  ;;  %v1261_v55 = vld [vmem:[%s1537_s3 + $0x38] sm:$0xff] (!%p1022_p13)  }
 0x133   : > { %v615_v14 = vld [vmem:[#allocation2] sm:$0xff] (!%p1022_p13) }
 0x134   : > { %602 = vst [vmem:[#allocation2 + $0x10] sm:$0xff] %v594_v3  ;;  %606 = vst [vmem:[#allocation2 + $0x30] sm:$0xff] %v598_v4  ;;  %v595_v7 = vadd.f32 %v1072_v5, %v354_v63  ;;  %v599_v8 = vadd.f32 %v1084_v6, %v358_v1  ;;  %v619_v16 = vld [vmem:[#allocation2 + $0x20] sm:$0xff] (!%p1022_p13)  ;;  %v627_v18 = vadd.f32 (!%p1022_p13), %v1023_v13, %v615_v14  ;;  %1134 = vmatpush3.bf16.msra.mxu1 (!%p1022_p13), %v1258_v49 }
 0x135   : > { %v616_v15 = vld [vmem:[#allocation2 + $0x8] sm:$0xff] (!%p1022_p13)  ;;  %v631_v20 = vadd.f32 (!%p1022_p13), %v1023_v13, %v619_v16  ;;  %1135 = vmatprep.subr.bf16.mxu1 (!%p1022_p13), %v1259_v52 }
 0x136   : > { %603 = vst [vmem:[#allocation2 + $0x18] sm:$0xff] %v595_v7  ;;  %607 = vst [vmem:[#allocation2 + $0x38] sm:$0xff] %v599_v8  ;;  %v620_v17 = vld [vmem:[#allocation2 + $0x28] sm:$0xff] (!%p1022_p13)  ;;  %v628_v19 = vadd.f32 (!%p1022_p13), %v1023_v13, %v616_v15  ;;  %v635_v22 = vmax.f32 (!%p1022_p13), %v627_v18, 0.0  ;;  %v1033_v7 = vld [vmem:[%s1538_s4 + $0x2] ss:$0 sm:$0xff] (!%p1022_p13) }
 0x137   : > { %v632_v21 = vadd.f32 %v1023_v13, %v620_v17  ;;  %v639_v25 = vmax.f32 %v631_v20, 0.0 }
 0x138   : > { %v636_v23 = vmax.f32 %v628_v19, 0.0  ;;  %1136 = vmatpush3.bf16.msra.mxu1 %v1259_v52 }
 0x139   : > { %v640_v26 = vmax.f32 %v632_v21, 0.0  ;;  %v643_v33 = vmax.f32 %v635_v22, %v639_v25  ;;  %1137 = vmatprep.subr.bf16.mxu1 %v1260_v54 }
 0x13b   : > { %v617_v28 = vld [vmem:[#allocation2 + $0x10] sm:$0xff]  ;;  %v644_v34 = vmax.f32 %v636_v23, %v640_v26 }
 0x13c   : > { %v621_v30 = vld [vmem:[#allocation2 + $0x30] sm:$0xff]  ;;  %v629_v38 = vadd.f32 %v1023_v13, %v617_v28  ;;  %1138 = vmatpush3.bf16.msra.mxu1 %v1260_v54 }
 0x13d   : > { %v618_v29 = vld [vmem:[#allocation2 + $0x18] sm:$0xff]  ;;  %v647_v36 = vpack.c.bf16 %v644_v34, %v643_v33  ;;  %v633_v40 = vadd.f32 %v1023_v13, %v621_v30  ;;  %1139 = vmatprep.subr.bf16.mxu1 %v1261_v55 }
 0x13e   : > { %v622_v35 = vld [vmem:[#allocation2 + $0x38] sm:$0xff]  ;;  %v630_v39 = vadd.f32 %v1023_v13, %v618_v29  ;;  %v637_v44 = vmax.f32 %v629_v38, 0.0 }
 0x13f   : > { %1121 = vmatprep.mubr.bf16.mxu0 %v647_v36  ;;  %v634_v41 = vadd.f32 %v1023_v13, %v622_v35  ;;  %v641_v46 = vmax.f32 %v633_v40, 0.0 }
 0x140   : > { %v638_v45 = vmax.f32 %v630_v39, 0.0  ;;  %1140 = vmatpush3.bf16.msra.mxu1 %v1261_v55 }
 0x141   : > { %v642_v47 = vmax.f32 %v634_v41, 0.0  ;;  %v645_v50 = vmax.f32 %v637_v44, %v641_v46 }
 0x143   : > { %v646_v51 = vmax.f32 %v638_v45, %v642_v47 }
 0x145   : > { %v648_v53 = vpack.c.bf16 %v646_v51, %v645_v50 }
 0x147   : > { %1122 = vmatmul.mubr.bf16.vlgmr.msra.gmra.mrb[0].mxu0 %v648_v53 }
 0x21a   : > { %v1123_v57 = vpop.f32.mrb[0].mxu0 }
 0x21b   : > { %v760_v58 = vadd.f32 %v1123_v57, %v1024_v56  ;;  %v751_v59 = vpop.f32.mrb[1].mxu0 }
 0x21c   : > { %v752_v60 = vadd.f32 %v1024_v56, %v751_v59  ;;  %v1124_v61 = vpop.f32.mrb[2].mxu0 }
 0x21d   : > { %v763_v62 = vadd.f32 %v1124_v61, %v1024_v56  ;;  %v754_v63 = vpop.f32.mrb[3].mxu0  ;;  %v768_v1 = vmax.f32 %v760_v58, 0.0 }
 0x21e   : > { %v755_v0 = vadd.f32 %v1024_v56, %v754_v63  ;;  %v766_v3 = vmax.f32 %v752_v60, 0.0 }
 0x21f   : > { %v769_v2 = vmax.f32 %v763_v62, 0.0 }
 0x220   : > { %v767_v4 = vmax.f32 %v755_v0, 0.0 }
 0x221   : > { %v771_v5 = vpack.c.bf16 %v769_v2, %v768_v1 }
 0x222   : > { %v770_v6 = vpack.c.bf16 %v767_v4, %v766_v3 }
 0x224   : > { %1141 = vmatprep.mubr.bf16.mxu1 %v770_v6 }
 0x225   : > { %1142 = vmatmul.mubr.bf16.vlgmr.msra.gmra.mrb[0].mxu1 %v771_v5 }
 0x2f8   : > { %v1143_v8 = vpop.f32.mrb[0].mxu1 }
 0x2f9   : > { %v874_v9 = vpop.f32.mrb[1].mxu1  ;;  %v883_v14 = vadd.f32 %v1143_v8, %v1033_v7 }
 0x2fa   : > { %v875_v10 = vadd.f32 %v1033_v7, %v874_v9  ;;  %v1144_v11 = vpop.f32.mrb[2].mxu1 }
 0x2fb   : > { %v877_v12 = vpop.f32.mrb[3].mxu1  ;;  %v886_v15 = vadd.f32 %v1144_v11, %v1033_v7  ;;  %891 = vst [vmem:[%s1422_s13 + $0x10] sm:$0xff] %v883_v14 }
 0x2fc   : > { %889 = vst [vmem:[%s1422_s13] sm:$0xff] %v875_v10  ;;  %v878_v13 = vadd.f32 %v1033_v7, %v877_v12 }
 0x2fd   : > { %892 = vst [vmem:[%s1422_s13 + $0x18] sm:$0xff] %v886_v15 }
 0x2fe   : > { %890 = vst [vmem:[%s1422_s13 + $0x8] sm:$0xff] %v878_v13 }
 0x2ff PF: > { %s15_s24 = sadd.s32 1, %s1316_s24   ;;  %s1540_s18 = smov %s1296_s19 }
 0x300   : > { %p12_p0 = scmp.ge.s32.totalorder %s15_s24, 6   ;;  %s1541_s19 = smov %s1400_s6 }
 0x301   : > { %s1542_s20 = smov %s1308_s22  ;;  %s1543_s21 = smov %s1312_s23 }
 0x302   : > { %s1544_s22 = smov %s1547_s25  ;;  %s1545_s23 = smov %s1551_s26 }
 0x303   :  { %14 = sbr.rel (!%p12_p0) target bundleno = 4 (0x4), region = 124 }

</bundles_post_ra>
